<compile_context>
chip_gen: v7x
topology: tpu7x:2x2x1
jax: 0.10.0
libtpu: 0.0.40
codegen_flags: <defaults>
</compile_context>

<pallas_src>
import jax
import jax.numpy as jnp
from jax.experimental import pallas as pl
from jax.experimental.pallas import tpu as pltpu

LANE = 128  # vreg lane width
SUB = 16    # sublane multiple covering f32 (8,·) and bf16 (16,·) packing


def _round_up(n, m):
    return (n + m - 1) // m * m


def _cdiv(a, b):
    return -(-a // b)


def mlp_kernel(x_ref, w1_ref, b1_ref, w2_ref, b2_ref, w3_ref, b3_ref, o_ref):
    # Whole 3-layer MLP fused on-chip for one batch tile.
    # x is cast to the weight/MXU dtype in-kernel (cheap vreg pack; no-op for f32).
    # All matmuls accumulate in f32 on the MXU; biases stay f32.
    x = x_ref[...].astype(w1_ref.dtype)

    h1 = jnp.dot(x, w1_ref[...], preferred_element_type=jnp.float32) + b1_ref[...]
    h1 = jnp.maximum(h1, 0.0).astype(w2_ref.dtype)

    h2 = jnp.dot(h1, w2_ref[...], preferred_element_type=jnp.float32) + b2_ref[...]
    h2 = jnp.maximum(h2, 0.0).astype(w3_ref.dtype)

    out = jnp.dot(h2, w3_ref[...], preferred_element_type=jnp.float32) + b3_ref[...]
    o_ref[...] = out.astype(o_ref.dtype)  # unpadded (tile, D_out) store


def prepare_params(params, *, compute_dtype=jnp.float32):
    """Pad hidden widths (30, 20) up to the 128-lane vreg width and cast weights to the
    MXU compute dtype. Padded rows/columns are numerically inert (exact 0 contributions
    through matmul, bias and ReLU). The output dim is left UNPADDED so the kernel writes
    only useful bytes. Do this once at param-build time."""
    w1, b1 = params["w1"], params["b1"]
    w2, b2 = params["w2"], params["b2"]
    w3, b3 = params["w3"], params["b3"]
    d_in, h1 = w1.shape
    h2 = w2.shape[1]
    d_out = w3.shape[1]
    h1p, h2p = _round_up(h1, LANE), _round_up(h2, LANE)

    def pad2(a, rows, cols):
        return jnp.pad(a, ((0, rows - a.shape[0]), (0, cols - a.shape[1])))

    return {
        "w1": pad2(w1, d_in, h1p).astype(compute_dtype),
        "b1": pad2(b1, 1, h1p).astype(jnp.float32),
        "w2": pad2(w2, h1p, h2p).astype(compute_dtype),
        "b2": pad2(b2, 1, h2p).astype(jnp.float32),
        "w3": pad2(w3, h2p, d_out).astype(compute_dtype),  # output dim unpadded
        "b3": b3.astype(jnp.float32),
        "d_out": d_out,
    }


def mlp_forward(x, prep, *, batch_tile=2048):
    """x: (B, input_dims). prep: output of prepare_params(). Returns (B, output_dims) f32."""
    B, D_in = x.shape
    w1, b1, w2, b2, w3, b3 = (prep[k] for k in ("w1", "b1", "w2", "b2", "w3", "b3"))
    d_out = prep["d_out"]
    assert w1.shape[0] == D_in
    h1p, h2p = w1.shape[1], w2.shape[1]

    # --- batch tile selection ---------------------------------------------------------
    tile = max(SUB, min(_round_up(batch_tile, SUB), _round_up(B, SUB)))
    # v7x megacore: if one tile would swallow the whole batch, split it so the grid has
    # >= 2 steps and ("parallel",) can shard across both TensorCores. Harmless on 1-TC chips.
    if B >= 2 * SUB and tile >= _round_up(B, SUB):
        tile = _round_up(_cdiv(B, 2), SUB)

    # VMEM budget per step: double-buffered x/out pipeline buffers + f32 intermediates.
    # Keep well under v7x's 64 MiB physical VMEM; shrink the tile if it would not fit.
    def tile_bytes(t):
        io = 2 * t * (D_in * x.dtype.itemsize + d_out * 4)  # pipelined in/out buffers
        act = t * (h1p + h2p) * 4                            # on-chip f32 h1/h2 temporaries
        return io + act

    VMEM_TILE_CAP = 40 * 1024 * 1024
    while tile > SUB and tile_bytes(tile) > VMEM_TILE_CAP:
        tile = max(SUB, _round_up(tile // 2, SUB))

    w_bytes = sum(int(a.size) * a.dtype.itemsize for a in (w1, b1, w2, b2, w3, b3))
    vmem_limit = int(min(max(tile_bytes(tile) + 2 * w_bytes + (8 << 20), 16 << 20), 48 << 20))

    # Ragged last tile handled by Pallas partial-block semantics: no pad/copy of x in the
    # wrapper; OOB input rows are unused garbage, OOB output rows are dropped on store.
    grid = (_cdiv(B, tile),)

    # Weights/biases: full (untiled) blocks with constant index maps -> Pallas keeps them
    # resident in VMEM across grid steps (no per-step re-fetch). They are tiny (<100 KiB).
    def full(arr):
        return pl.BlockSpec(arr.shape, lambda i: (0,) * arr.ndim)

    out = pl.pallas_call(
        mlp_kernel,
        out_shape=jax.ShapeDtypeStruct((B, d_out), jnp.float32),  # unpadded output stream
        grid_spec=pltpu.PrefetchScalarGridSpec(
            num_scalar_prefetch=0,
            grid=grid,
            in_specs=[
                pl.BlockSpec((tile, D_in), lambda i: (i, 0)),  # x tile over batch
                full(w1), full(b1),
                full(w2), full(b2),
                full(w3), full(b3),
            ],
            out_specs=pl.BlockSpec((tile, d_out), lambda i: (i, 0)),
        ),
        compiler_params=pltpu.CompilerParams(
            dimension_semantics=("parallel",),   # megacore-shardable batch axis
            vmem_limit_bytes=vmem_limit,
        ),
    )(x, w1, b1, w2, b2, w3, b3)
    return out


def init_params(key, input_dims, output_dims):
    """Deterministic init mirroring torch.nn.Linear's U(-1/sqrt(fan_in), 1/sqrt(fan_in)).
    Weights stored as (in, out) — the transpose of PyTorch's (out, in)."""
    dims = [(input_dims, 30), (30, 20), (20, output_dims)]
    params = {}
    for idx, (fan_in, fan_out) in enumerate(dims, start=1):
        key, kw, kb = jax.random.split(key, 3)
        bound = 1.0 / jnp.sqrt(jnp.float32(fan_in))
        params[f"w{idx}"] = jax.random.uniform(
            kw, (fan_in, fan_out), jnp.float32, minval=-bound, maxval=bound
        )
        params[f"b{idx}"] = jax.random.uniform(
            kb, (1, fan_out), jnp.float32, minval=-bound, maxval=bound
        )
    return params


def mlp_reference(x, params):
    h1 = jnp.maximum(x @ params["w1"] + params["b1"], 0.0)
    h2 = jnp.maximum(h1 @ params["w2"] + params["b2"], 0.0)
    return h2 @ params["w3"] + params["b3"]


if __name__ == "__main__":
    key = jax.random.PRNGKey(0)
    key, kx = jax.random.split(key)

    # Small shapes; batch=100 deliberately not a multiple of 16 to exercise the ragged
    # last tile (partial-block reads/writes) and the >=2-step megacore split.
    batch, input_dims, output_dims = 100, 32, 8
    x = jax.random.normal(kx, (batch, input_dims), jnp.float32)
    params = init_params(key, input_dims, output_dims)
    ref = mlp_reference(x, params)

    # f32 path (exact check).
    out_f32 = jax.block_until_ready(
        mlp_forward(x, prepare_params(params, compute_dtype=jnp.float32))
    )
    assert out_f32.shape == (batch, output_dims)
    assert jnp.allclose(out_f32, ref, atol=1e-4, rtol=1e-4)

    # bf16 compute path (halves the x/weight HBM read streams; valid on v5e/v6e/v7x).
    out_bf16 = jax.block_until_ready(
        mlp_forward(x, prepare_params(params, compute_dtype=jnp.bfloat16))
    )
    assert out_bf16.shape == (batch, output_dims)
    assert jnp.allclose(out_bf16, ref, atol=1e-1, rtol=1e-1)

    print("KERNEL_OK")
</pallas_src>

<mosaic_0001>
module attributes {stable_mosaic.version = 11 : i64} {
  func.func @mlp_kernel(%arg0: i32, %arg1: memref<64x32xf32, #tpu.memory_space<vmem>>, %arg2: memref<32x128xf32, #tpu.memory_space<vmem>>, %arg3: memref<1x128xf32, #tpu.memory_space<vmem>>, %arg4: memref<128x128xf32, #tpu.memory_space<vmem>>, %arg5: memref<1x128xf32, #tpu.memory_space<vmem>>, %arg6: memref<128x8xf32, #tpu.memory_space<vmem>>, %arg7: memref<1x8xf32, #tpu.memory_space<vmem>>, %arg8: memref<64x8xf32, #tpu.memory_space<vmem>>) attributes {dimension_semantics = [#tpu.dimension_semantics<parallel>], iteration_bounds = array<i64: 2>, scalar_prefetch = 0 : i64, scratch_operands = 0 : i64, tpu.core_type = #tpu.core_type<tc>, window_params = [{transform_indices = @transform_0, window_bounds = array<i64: 64, 32>}, {pipeline_mode = #tpu.pipeline_mode<synchronous>, transform_indices = @transform_1, window_bounds = array<i64: 32, 128>}, {pipeline_mode = #tpu.pipeline_mode<synchronous>, transform_indices = @transform_2, window_bounds = array<i64: 1, 128>}, {pipeline_mode = #tpu.pipeline_mode<synchronous>, transform_indices = @transform_3, window_bounds = array<i64: 128, 128>}, {pipeline_mode = #tpu.pipeline_mode<synchronous>, transform_indices = @transform_4, window_bounds = array<i64: 1, 128>}, {pipeline_mode = #tpu.pipeline_mode<synchronous>, transform_indices = @transform_5, window_bounds = array<i64: 128, 8>}, {pipeline_mode = #tpu.pipeline_mode<synchronous>, transform_indices = @transform_6, window_bounds = array<i64: 1, 8>}, {transform_indices = @transform_7, window_bounds = array<i64: 64, 8>}]} {
    %c0 = arith.constant 0 : index
    %c0_0 = arith.constant 0 : index
    %0 = vector.load %arg1[%c0, %c0_0] : memref<64x32xf32, #tpu.memory_space<vmem>>, vector<64x32xf32>
    %c0_1 = arith.constant 0 : index
    %c0_2 = arith.constant 0 : index
    %1 = vector.load %arg2[%c0_1, %c0_2] : memref<32x128xf32, #tpu.memory_space<vmem>>, vector<32x128xf32>
    %cst = arith.constant dense<0.000000e+00> : vector<64x128xf32>
    %2 = tpu.matmul %0, %1, %cst {dimension_numbers = #tpu.dot_dimension_numbers<[1], [0], [0], [1], [0, 0, 1, 1], [], []>} : vector<64x32xf32>, vector<32x128xf32>, vector<64x128xf32> -> vector<64x128xf32>
    %c0_3 = arith.constant 0 : index
    %c0_4 = arith.constant 0 : index
    %3 = vector.load %arg3[%c0_3, %c0_4] : memref<1x128xf32, #tpu.memory_space<vmem>>, vector<1x128xf32>
    %4 = vector.broadcast %3 : vector<1x128xf32> to vector<64x128xf32>
    %5 = arith.addf %2, %4 : vector<64x128xf32>
    %cst_5 = arith.constant 0.000000e+00 : f32
    %6 = vector.broadcast %cst_5 : f32 to vector<64x128xf32>
    %7 = arith.maximumf %5, %6 : vector<64x128xf32>
    %c0_6 = arith.constant 0 : index
    %c0_7 = arith.constant 0 : index
    %8 = vector.load %arg4[%c0_6, %c0_7] : memref<128x128xf32, #tpu.memory_space<vmem>>, vector<128x128xf32>
    %cst_8 = arith.constant dense<0.000000e+00> : vector<64x128xf32>
    %9 = tpu.matmul %7, %8, %cst_8 {dimension_numbers = #tpu.dot_dimension_numbers<[1], [0], [0], [1], [0, 0, 1, 1], [], []>} : vector<64x128xf32>, vector<128x128xf32>, vector<64x128xf32> -> vector<64x128xf32>
    %c0_9 = arith.constant 0 : index
    %c0_10 = arith.constant 0 : index
    %10 = vector.load %arg5[%c0_9, %c0_10] : memref<1x128xf32, #tpu.memory_space<vmem>>, vector<1x128xf32>
    %11 = vector.broadcast %10 : vector<1x128xf32> to vector<64x128xf32>
    %12 = arith.addf %9, %11 : vector<64x128xf32>
    %cst_11 = arith.constant 0.000000e+00 : f32
    %13 = vector.broadcast %cst_11 : f32 to vector<64x128xf32>
    %14 = arith.maximumf %12, %13 : vector<64x128xf32>
    %c0_12 = arith.constant 0 : index
    %c0_13 = arith.constant 0 : index
    %15 = vector.load %arg6[%c0_12, %c0_13] : memref<128x8xf32, #tpu.memory_space<vmem>>, vector<128x8xf32>
    %cst_14 = arith.constant dense<0.000000e+00> : vector<64x8xf32>
    %16 = tpu.matmul %14, %15, %cst_14 {dimension_numbers = #tpu.dot_dimension_numbers<[1], [0], [0], [1], [0, 0, 1, 1], [], []>} : vector<64x128xf32>, vector<128x8xf32>, vector<64x8xf32> -> vector<64x8xf32>
    %c0_15 = arith.constant 0 : index
    %c0_16 = arith.constant 0 : index
    %17 = vector.load %arg7[%c0_15, %c0_16] : memref<1x8xf32, #tpu.memory_space<vmem>>, vector<1x8xf32>
    %18 = vector.broadcast %17 : vector<1x8xf32> to vector<64x8xf32>
    %19 = arith.addf %16, %18 : vector<64x8xf32>
    %c0_17 = arith.constant 0 : index
    %c0_18 = arith.constant 0 : index
    %20 = vector.load %arg8[%c0_17, %c0_18] : memref<64x8xf32, #tpu.memory_space<vmem>>, vector<64x8xf32>
    tpu.vector_store %arg8[%c0_17, %c0_18], %19 {strides = array<i32>} : memref<64x8xf32, #tpu.memory_space<vmem>>, vector<64x8xf32>,
    return
  }
  func.func @transform_0(%arg0: i32) -> (i32, i32) {
    %c0_i32 = arith.constant 0 : i32
    %c0_i32_0 = arith.constant 0 : i32
    return %arg0, %c0_i32 : i32, i32
  }
  func.func @transform_1(%arg0: i32) -> (i32, i32) {
    %c0_i32 = arith.constant 0 : i32
    %c0_i32_0 = arith.constant 0 : i32
    %c0_i32_1 = arith.constant 0 : i32
    return %c0_i32, %c0_i32_0 : i32, i32
  }
  func.func @transform_2(%arg0: i32) -> (i32, i32) {
    %c0_i32 = arith.constant 0 : i32
    %c0_i32_0 = arith.constant 0 : i32
    %c0_i32_1 = arith.constant 0 : i32
    return %c0_i32, %c0_i32_0 : i32, i32
  }
  func.func @transform_3(%arg0: i32) -> (i32, i32) {
    %c0_i32 = arith.constant 0 : i32
    %c0_i32_0 = arith.constant 0 : i32
    %c0_i32_1 = arith.constant 0 : i32
    return %c0_i32, %c0_i32_0 : i32, i32
  }
  func.func @transform_4(%arg0: i32) -> (i32, i32) {
    %c0_i32 = arith.constant 0 : i32
    %c0_i32_0 = arith.constant 0 : i32
    %c0_i32_1 = arith.constant 0 : i32
    return %c0_i32, %c0_i32_0 : i32, i32
  }
  func.func @transform_5(%arg0: i32) -> (i32, i32) {
    %c0_i32 = arith.constant 0 : i32
    %c0_i32_0 = arith.constant 0 : i32
    %c0_i32_1 = arith.constant 0 : i32
    return %c0_i32, %c0_i32_0 : i32, i32
  }
  func.func @transform_6(%arg0: i32) -> (i32, i32) {
    %c0_i32 = arith.constant 0 : i32
    %c0_i32_0 = arith.constant 0 : i32
    %c0_i32_1 = arith.constant 0 : i32
    return %c0_i32, %c0_i32_0 : i32, i32
  }
  func.func @transform_7(%arg0: i32) -> (i32, i32) {
    %c0_i32 = arith.constant 0 : i32
    %c0_i32_0 = arith.constant 0 : i32
    return %arg0, %c0_i32 : i32, i32
  }
}

</mosaic_0001>

<bundles_post_ra>
// kernel: tpu_custom_call.1
= control target key start
LH: loop header
LB: loop body
LE: loop exit
PB: predicated region body
PF: predicated region fallthrough
CT: control target
= control target key end

     0   :  { %s1467_s24 = smov 0   ;;  %s1469_s25 = smov 0   ;;  %s1719_s0 = inlined_call_operand.vmem [shape: f32[100,32], index: 0, kind: input, shape index: {}]   ;;  %s1720_s1 = inlined_call_operand.vmem [shape: f32[32,128], index: 1, kind: input, shape index: {}]   ;;  %s1721_s2 = inlined_call_operand.vmem [shape: f32[1,128], index: 2, kind: input, shape index: {}]   ;;  %s1722_s3 = inlined_call_operand.vmem [shape: f32[128,128], index: 3, kind: input, shape index: {}]   ;;  %s1723_s4 = inlined_call_operand.vmem [shape: f32[1,128], index: 4, kind: input, shape index: {}]   ;;  %s1724_s5 = inlined_call_operand.vmem [shape: f32[128,8], index: 5, kind: input, shape index: {}]   ;;  %s1725_s6 = inlined_call_operand.vmem [shape: f32[1,8], index: 6, kind: input, shape index: {}]   ;;  %s1726_s7 = inlined_call_operand.vmem [shape: f32[100,8], index: 7, kind: output, shape index: {}]  }
   0x1   :  { %s1471_s26 = smov 0  }
   0x2 LB: > { %s1480_s27 = sadd.s32 4294967295, %s1393_s26   ;;  %s1482_s28 = sadd.s32 1, %s1393_s26   ;;  %s1393_s26 = sphi %s1471_s26, %s1733_s26   ;;  %s1389_s25 = sphi %s1469_s25, %s1732_s25   ;;  %s1385_s24 = sphi %s1467_s24, %s1731_s24  }
   0x3   : > { %s173_s29 = ssub.s32 %s1393_s26, %s1482_s28  ;;  %s176_s30 = sadd.s32 1, %s1389_s25 }
   0x4   : > { %p174_p0 = scmp.eq.s32.totalorder %s173_s29, 0  ;;  %p186_p1 = scmp.ne.s32.totalorder %s1389_s25, %s1385_s24 }
   0x5   : > { %p187_p2 = scmp.eq.s32.totalorder %s1480_s27, 1  ;;  %p976_p3 = scmp.ge.s32.totalorder %s1393_s26, 1 }
   0x6   : > { %s1490_s8 = scalar_select %p174_p0, %s1389_s25, %s176_s30  }
   0x7   : > { %p1492_p4 = por %p187_p2, %p186_p1  ;;  %p246_p5 = scmp.lt.s32.totalorder %s1393_s26, 3 }
   0x9   : > { %p247_p6 = pnand %p976_p3, %p246_p5 }
   0xa   : > { %v308_v0 = vld [vmem:[%s1720_s1] sm:$0xff] (!%p247_p6)  ;;  %v309_v1 = vld [vmem:[%s1720_s1 + $0x8] sm:$0xff] (!%p247_p6)  ;;  %v310_v2 = vld [vmem:[%s1720_s1 + $0x10] sm:$0xff] (!%p247_p6)  ;;  %s1506_s16 = sshll.u32 (!%p247_p6), %s1480_s27, 3  ;;  %vm319_vm0 = vcmask (!%p247_p6), 261120   ;;  %s278_s11 = sand.u32 (!%p247_p6), 1, %s1385_s24  }
   0xb   : > { %250 = sbr.rel (%p247_p6) target bundleno = 737 (0x2e1), region = 48  ;;  %v1179_v3 = vpack.c.bf16 (!%p247_p6), %v309_v1, %v308_v0  ;;  %v311_v4 = vld [vmem:[%s1720_s1 + $0x18] sm:$0xff] (!%p247_p6)  ;;  %p286_p7 = scmp.lt.s32.totalorder (!%p247_p6), %s1506_s16, 12  ;;  %v457_v5 = vld [vmem:[%s1722_s3] sm:$0xff] (!%p247_p6)  ;;  %v458_v6 = vld [vmem:[%s1722_s3 + $0x8] sm:$0xff] (!%p247_p6)  ;;  %vm721_vm1 = vcmask (!%p247_p6), 64512  }
   0xc   : > { %v1183_v7 = vpack.c.bf16 (!%p247_p6), %v311_v4, %v310_v2  ;;  %v1187_v8 = vpack.c.bf16 (!%p247_p6), %v458_v6, %v457_v5  ;;  %v459_v9 = vld [vmem:[%s1722_s3 + $0x10] sm:$0xff] (!%p247_p6)  ;;  %v460_v10 = vld [vmem:[%s1722_s3 + $0x18] sm:$0xff] (!%p247_p6)  ;;  %v461_v12 = vld [vmem:[%s1722_s3 + $0x20] sm:$0xff] (!%p247_p6)  ;;  %s977_s12 = sshll.u32 (!%p247_p6), %s278_s11, 6 }
   0xd   : > { %1180 = vmatprep.subr.bf16.mxu0 (!%p247_p6), %v1179_v3  ;;  %v1191_v11 = vpack.c.bf16 (!%p247_p6), %v460_v10, %v459_v9  ;;  %v462_v13 = vld [vmem:[%s1722_s3 + $0x28] sm:$0xff] (!%p247_p6)  ;;  %v463_v16 = vld [vmem:[%s1722_s3 + $0x30] sm:$0xff] (!%p247_p6)  ;;  %v464_v17 = vld [vmem:[%s1722_s3 + $0x38] sm:$0xff] (!%p247_p6) }
   0xe   : > { %1182 = vmatpush3.bf16.msra.mxu0 (!%p247_p6), %v1179_v3  ;;  %1188 = vmatprep.subr.bf16.mxu1 (!%p247_p6), %v1187_v8  ;;  %v1195_v14 = vpack.c.bf16 (!%p247_p6), %v462_v13, %v461_v12  ;;  %v1199_v20 = vpack.c.bf16 (!%p247_p6), %v464_v17, %v463_v16  ;;  %v465_v21 = vld [vmem:[%s1722_s3 + $0x40] sm:$0xff] (!%p247_p6)  ;;  %v466_v22 = vld [vmem:[%s1722_s3 + $0x48] sm:$0xff] (!%p247_p6)  ;;  %v467_v26 = vld [vmem:[%s1722_s3 + $0x50] sm:$0xff] (!%p247_p6) }
   0xf   : > { %1184 = vmatprep.subr.bf16.mxu0 (!%p247_p6), %v1183_v7  ;;  %1190 = vmatpush3.bf16.msra.mxu1 (!%p247_p6), %v1187_v8  ;;  %v1203_v25 = vpack.c.bf16 (!%p247_p6), %v466_v22, %v465_v21  ;;  %v468_v27 = vld [vmem:[%s1722_s3 + $0x58] sm:$0xff] (!%p247_p6)  ;;  %v469_v31 = vld [vmem:[%s1722_s3 + $0x60] sm:$0xff] (!%p247_p6)  ;;  %v470_v32 = vld [vmem:[%s1722_s3 + $0x68] sm:$0xff] (!%p247_p6) }
  0x10   : > { %1192 = vmatprep.subr.bf16.mxu1 (!%p247_p6), %v1191_v11  ;;  %v1207_v30 = vpack.c.bf16 (!%p247_p6), %v468_v27, %v467_v26  ;;  %v1211_v34 = vpack.c.bf16 (!%p247_p6), %v470_v32, %v469_v31  ;;  %v471_v35 = vld [vmem:[%s1722_s3 + $0x70] sm:$0xff] (!%p247_p6)  ;;  %v472_v36 = vld [vmem:[%s1722_s3 + $0x78] sm:$0xff] (!%p247_p6)  ;;  %v593_v38 = vld [vmem:[%s1724_s5] sm:$0xff] (!%p247_p6) }
  0x11   : > { %v1215_v37 = vpack.c.bf16 (!%p247_p6), %v472_v36, %v471_v35  ;;  %v594_v39 = vld [vmem:[%s1724_s5 + $0x8] sm:$0xff] (!%p247_p6)  ;;  %v595_v40 = vld [vmem:[%s1724_s5 + $0x10] sm:$0xff] (!%p247_p6)  ;;  %v596_v42 = vld [vmem:[%s1724_s5 + $0x18] sm:$0xff] (!%p247_p6) }
  0x12   : > { %s287_s10 = scalar_select %p286_p7, %s1506_s16, 12  ;;  %1186 = vmatpush3.bf16.msra.mxu0 %v1183_v7  ;;  %v1219_v41 = vpack.c.bf16 %v594_v39, %v593_v38  ;;  %v1223_v43 = vpack.c.bf16 %v596_v42, %v595_v40  ;;  %v597_v44 = vld [vmem:[%s1724_s5 + $0x20] sm:$0xff]  ;;  %v598_v45 = vld [vmem:[%s1724_s5 + $0x28] sm:$0xff]  ;;  %v599_v47 = vld [vmem:[%s1724_s5 + $0x30] sm:$0xff] }
  0x13   : > { %1194 = vmatpush3.bf16.msra.mxu1 %v1191_v11  ;;  %v1227_v46 = vpack.c.bf16 %v598_v45, %v597_v44  ;;  %v600_v48 = vld [vmem:[%s1724_s5 + $0x38] sm:$0xff]  ;;  %v601_v50 = vld [vmem:[%s1724_s5 + $0x40] sm:$0xff]  ;;  %v602_v51 = vld [vmem:[%s1724_s5 + $0x48] sm:$0xff]  ;;  %s738_s24 = ssub.s32 (%p1492_p4), 13, %s1506_s16  ;;  %s1008_s17 = sshll.u32 (%p1492_p4), %s1480_s27, 6 }
  0x14   : > { %s979_s15 = sshll.u32 %s287_s10, 3  ;;  %1196 = vmatprep.subr.bf16.mxu1 %v1195_v14  ;;  %1220 = vmatprep.subr.bf16.mxu0 %v1219_v41  ;;  %v1231_v49 = vpack.c.bf16 %v600_v48, %v599_v47  ;;  %v1235_v52 = vpack.c.bf16 %v602_v51, %v601_v50  ;;  %v603_v53 = vld [vmem:[%s1724_s5 + $0x50] sm:$0xff]  ;;  %v604_v54 = vld [vmem:[%s1724_s5 + $0x58] sm:$0xff]  ;;  %v605_v56 = vld [vmem:[%s1724_s5 + $0x60] sm:$0xff]  ;;  %p739_p8 = scmp.lt.s32.totalorder (%p1492_p4), %s738_s24, 8 }
  0x15   : > { %s1534_s19 = scalar_lea.vmem %s1719_s0, %s979_s15  ;;  %v1239_v55 = vpack.c.bf16 %v604_v54, %v603_v53  ;;  %v606_v57 = vld [vmem:[%s1724_s5 + $0x68] sm:$0xff]  ;;  %v980_v59 = vld [vmem:[%s1721_s2] ss:$0 sm:$0xff]  ;;  %v608_v21 = vld [vmem:[%s1724_s5 + $0x78] sm:$0xff]  ;;  %s1640_s15 = scalar_lea.vmem [#allocation2], %s977_s12  }
  0x16   : > { %v300_v15 = vld [vmem:[%s1534_s19] sm:$0xff]  ;;  %v301_v18 = vld [vmem:[%s1534_s19 + $0x8] sm:$0xff]  ;;  %v302_v19 = vld [vmem:[%s1534_s19 + $0x10] sm:$0xff]  ;;  %v1243_v58 = vpack.c.bf16 %v606_v57, %v605_v56  ;;  %s1665_s21 = scalar_lea.vmem (%p1492_p4), %s1726_s7, %s1008_s17  }
  0x17   : > { %1079 = vmatprep.mubr.msk.f32.mxu0 %vm319_vm0, %v300_v15  ;;  %v303_v23 = vld [vmem:[%s1534_s19 + $0x18] sm:$0xff]  ;;  %v304_v24 = vld [vmem:[%s1534_s19 + $0x20] sm:$0xff]  ;;  %1198 = vmatpush3.bf16.msra.mxu1 %v1195_v14  ;;  %v305_v28 = vld [vmem:[%s1534_s19 + $0x28] sm:$0xff] }
  0x18   : > { %1080 = vmatmul.mubr.msk.f32.vlgmr.msra.gmra.mrb[0].mxu0 %vm319_vm0, %v301_v18  ;;  %1200 = vmatprep.subr.bf16.mxu1 %v1199_v20  ;;  %v306_v29 = vld [vmem:[%s1534_s19 + $0x30] sm:$0xff]  ;;  %v307_v33 = vld [vmem:[%s1534_s19 + $0x38] sm:$0xff]  ;;  %v990_v48 = vld [vmem:[%s1725_s6] ss:$0 sm:$0xff] }
  0x19   : > { %1082 = vmatprep.mubr.msk.f32.mxu0 %vm319_vm0, %v302_v19  ;;  %1222 = vmatpush3.bf16.msra.mxu0 %v1219_v41 }
  0x1a   : > { %1224 = vmatprep.subr.bf16.mxu0 %v1223_v43 }
  0x1b   : > { %1202 = vmatpush3.bf16.msra.mxu1 %v1199_v20  ;;  %v607_v20 = vld [vmem:[%s1724_s5 + $0x70] sm:$0xff] }
  0x1c   : > { %1083 = vmatmul.mubr.msk.f32.gmra.mrb[2].mxu0 %vm319_vm0, %v303_v23  ;;  %1204 = vmatprep.subr.bf16.mxu1 %v1203_v25  ;;  %v1247_v22 = vpack.c.bf16 %v608_v21, %v607_v20  ;;  %v989_v23 = vld [vmem:[%s1723_s4] ss:$0 sm:$0xff] }
  0x1d   : > { %1085 = vmatprep.mubr.msk.f32.mxu0 %vm319_vm0, %v304_v24  ;;  %1226 = vmatpush3.bf16.msra.mxu0 %v1223_v43 }
  0x1e   : > { %1228 = vmatprep.subr.bf16.mxu0 %v1227_v46 }
  0x1f   : > { %1206 = vmatpush3.bf16.msra.mxu1 %v1203_v25 }
  0x20   : > { %1086 = vmatmul.mubr.msk.f32.gmra.mrb[4].mxu0 %vm319_vm0, %v305_v28  ;;  %1208 = vmatprep.subr.bf16.mxu1 %v1207_v30 }
  0x21   : > { %1088 = vmatprep.mubr.msk.f32.mxu0 %vm319_vm0, %v306_v29  ;;  %1230 = vmatpush3.bf16.msra.mxu0 %v1227_v46 }
  0x22   : > { %1232 = vmatprep.subr.bf16.mxu0 %v1231_v49 }
  0x23   : > { %1210 = vmatpush3.bf16.msra.mxu1 %v1207_v30 }
  0x24   : > { %1089 = vmatmul.mubr.msk.f32.gmra.mrb[6].mxu0 %vm319_vm0, %v307_v33  ;;  %1212 = vmatprep.subr.bf16.mxu1 %v1211_v34 }
  0x25   : > { %1234 = vmatpush3.bf16.msra.mxu0 %v1231_v49 }
  0x26   : > { %1236 = vmatprep.subr.bf16.mxu0 %v1235_v52 }
  0x27   : > { %1214 = vmatpush3.bf16.msra.mxu1 %v1211_v34 }
  0x28   : > { %1216 = vmatprep.subr.bf16.mxu1 %v1215_v37 }
  0x29   : > { %1238 = vmatpush3.bf16.msra.mxu0 %v1235_v52 }
  0x2a   : > { %1240 = vmatprep.subr.bf16.mxu0 %v1239_v55 }
  0x2b   : > { %1218 = vmatpush3.bf16.msra.mxu1 %v1215_v37 }
  0x2d   : > { %1242 = vmatpush3.bf16.msra.mxu0 %v1239_v55 }
  0x2e   : > { %1244 = vmatprep.subr.bf16.mxu0 %v1243_v58 }
  0x31   : > { %1246 = vmatpush3.bf16.msra.mxu0 %v1243_v58 }
  0x32   : > { %1248 = vmatprep.subr.bf16.mxu0 %v1247_v22 }
  0x35   : > { %1250 = vmatpush3.bf16.msra.mxu0 %v1247_v22 }
  0xeb   : > { %v1081_v60 = vpop.f32.mrb[0].mxu0 }
  0xec   : > { %v416_v61 = vadd.f32 %v1081_v60, %v980_v59  ;;  %v410_v62 = vpop.f32.mrb[1].mxu0 }
  0xed   : > { %v411_v63 = vadd.f32 %v980_v59, %v410_v62 }
  0xee   : > { %v450_v2 = vmax.f32 %v416_v61, 0.0 }
  0xef   : > { %v1084_v0 = vpop.f32.mrb[2].mxu0  ;;  %v449_v1 = vmax.f32 %v411_v63, 0.0 }
  0xf0   : > { %v426_v3 = vadd.f32 %v1084_v0, %v980_v59  ;;  %v420_v4 = vpop.f32.mrb[3].mxu0 }
  0xf1   : > { %v421_v5 = vadd.f32 %v980_v59, %v420_v4  ;;  %1123 = vmatprep.mubr.f32.mxu1 %v449_v1 }
  0xf2   : > { %1124 = vmatmul.mubr.f32.vlgmr.msra.gmra.mrb[0].mxu1 %v450_v2  ;;  %v452_v8 = vmax.f32 %v426_v3, 0.0 }
  0xf3   : > { %v451_v6 = vmax.f32 %v421_v5, 0.0  ;;  %v1087_v7 = vpop.f32.mrb[4].mxu0 }
  0xf4   : > { %v436_v9 = vadd.f32 %v1087_v7, %v980_v59  ;;  %v430_v10 = vpop.f32.mrb[5].mxu0 }
  0xf5   : > { %v431_v11 = vadd.f32 %v980_v59, %v430_v10  ;;  %1126 = vmatprep.mubr.f32.mxu1 %v451_v6 }
  0xf6   : > { %1127 = vmatmul.mubr.f32.gmra.mrb[2].mxu1 %v452_v8  ;;  %v454_v14 = vmax.f32 %v436_v9, 0.0 }
  0xf7   : > { %v453_v12 = vmax.f32 %v431_v11, 0.0  ;;  %v1090_v13 = vpop.f32.mrb[6].mxu0 }
  0xf8   : > { %v446_v15 = vadd.f32 %v1090_v13, %v980_v59  ;;  %v440_v16 = vpop.f32.mrb[7].mxu0 }
  0xf9   : > { %v441_v17 = vadd.f32 %v980_v59, %v440_v16  ;;  %1129 = vmatprep.mubr.f32.mxu1 %v453_v12 }
  0xfa   : > { %1130 = vmatmul.mubr.f32.gmra.mrb[4].mxu1 %v454_v14  ;;  %v456_v19 = vmax.f32 %v446_v15, 0.0 }
  0xfb   : > { %v455_v18 = vmax.f32 %v441_v17, 0.0 }
  0xfd   : > { %1132 = vmatprep.mubr.f32.mxu1 %v455_v18 }
  0xfe   : > { %1133 = vmatmul.mubr.f32.gmra.mrb[6].mxu1 %v456_v19 }
 0x1c5   : > { %v1125_v24 = vpop.f32.mrb[0].mxu1 }
 0x1c6   : > { %v552_v25 = vadd.f32 %v1125_v24, %v989_v23  ;;  %v546_v26 = vpop.f32.mrb[1].mxu1 }
 0x1c7   : > { %v547_v27 = vadd.f32 %v989_v23, %v546_v26 }
 0x1c8   : > { %v586_v30 = vmax.f32 %v552_v25, 0.0 }
 0x1c9   : > { %v585_v28 = vmax.f32 %v547_v27, 0.0  ;;  %v1128_v29 = vpop.f32.mrb[2].mxu1 }
 0x1ca   : > { %v562_v31 = vadd.f32 %v1128_v29, %v989_v23  ;;  %v556_v32 = vpop.f32.mrb[3].mxu1 }
 0x1cb   : > { %v557_v33 = vadd.f32 %v989_v23, %v556_v32  ;;  %1167 = vmatprep.mubr.f32.mxu0 %v585_v28 }
 0x1cc   : > { %1168 = vmatmul.mubr.f32.vlgmr.msra.gmra.mrb[8].mxu0 %v586_v30  ;;  %v588_v36 = vmax.f32 %v562_v31, 0.0 }
 0x1cd   : > { %v587_v34 = vmax.f32 %v557_v33, 0.0  ;;  %v1131_v35 = vpop.f32.mrb[4].mxu1 }
 0x1ce   : > { %v572_v37 = vadd.f32 %v1131_v35, %v989_v23  ;;  %v566_v38 = vpop.f32.mrb[5].mxu1 }
 0x1cf   : > { %v567_v39 = vadd.f32 %v989_v23, %v566_v38  ;;  %1170 = vmatprep.mubr.f32.mxu0 %v587_v34 }
 0x1d0   : > { %1171 = vmatmul.mubr.f32.gmra.mrb[10].mxu0 %v588_v36  ;;  %v590_v42 = vmax.f32 %v572_v37, 0.0 }
 0x1d1   : > { %v589_v40 = vmax.f32 %v567_v39, 0.0  ;;  %v1134_v41 = vpop.f32.mrb[6].mxu1 }
 0x1d2   : > { %v582_v43 = vadd.f32 %v1134_v41, %v989_v23  ;;  %v576_v44 = vpop.f32.mrb[7].mxu1 }
 0x1d3   : > { %v577_v45 = vadd.f32 %v989_v23, %v576_v44  ;;  %1173 = vmatprep.mubr.f32.mxu0 %v589_v40 }
 0x1d4   : > { %1174 = vmatmul.mubr.f32.gmra.mrb[12].mxu0 %v590_v42  ;;  %v592_v47 = vmax.f32 %v582_v43, 0.0 }
 0x1d5   : > { %v591_v46 = vmax.f32 %v577_v45, 0.0 }
 0x1d7   : > { %1176 = vmatprep.mubr.f32.mxu0 %v591_v46 }
 0x1d8   : > { %1177 = vmatmul.mubr.f32.gmra.mrb[14].mxu0 %v592_v47 }
 0x29f   : > { %v1169_v49 = vpop.f32.mrb[8].mxu0 }
 0x2a0   : > { %v688_v50 = vadd.f32 %v1169_v49, %v990_v48  ;;  %v682_v51 = vpop.f32.mrb[9].mxu0 }
 0x2a1   : > { %v683_v52 = vadd.f32 %v990_v48, %v682_v51 }
 0x2a2   : > { %723 = vst.msk [vmem:[%s1640_s15 + $0x8] sm:$0xff] %vm721_vm1, %v688_v50 }
 0x2a3   : > { %722 = vst.msk [vmem:[%s1640_s15] sm:$0xff] %vm721_vm1, %v683_v52  ;;  %v1172_v53 = vpop.f32.mrb[10].mxu0 }
 0x2a4   : > { %v698_v54 = vadd.f32 %v1172_v53, %v990_v48  ;;  %v692_v55 = vpop.f32.mrb[11].mxu0 }
 0x2a5   : > { %v693_v56 = vadd.f32 %v990_v48, %v692_v55 }
 0x2a6   : > { %725 = vst.msk [vmem:[%s1640_s15 + $0x18] sm:$0xff] %vm721_vm1, %v698_v54 }
 0x2a7   : > { %724 = vst.msk [vmem:[%s1640_s15 + $0x10] sm:$0xff] %vm721_vm1, %v693_v56  ;;  %v1175_v57 = vpop.f32.mrb[12].mxu0 }
 0x2a8   : > { %v708_v58 = vadd.f32 %v1175_v57, %v990_v48  ;;  %v702_v59 = vpop.f32.mrb[13].mxu0 }
 0x2a9   : > { %v703_v60 = vadd.f32 %v990_v48, %v702_v59  ;;  %736 = sbr.rel (!%p1492_p4) target bundleno = 737 (0x2e1), region = 52 }
 0x2aa   : > { %727 = vst.msk [vmem:[%s1640_s15 + $0x28] sm:$0xff] %vm721_vm1, %v708_v58 }
 0x2ab   : > { %726 = vst.msk [vmem:[%s1640_s15 + $0x20] sm:$0xff] %vm721_vm1, %v703_v60  ;;  %v1178_v61 = vpop.f32.mrb[14].mxu0 }
 0x2ac   : > { %v718_v62 = vadd.f32 %v1178_v61, %v990_v48  ;;  %v712_v63 = vpop.f32.mrb[15].mxu0 }
 0x2ad   : > { %v713_v0 = vadd.f32 %v990_v48, %v712_v63 }
 0x2ae   : > { %729 = vst.msk [vmem:[%s1640_s15 + $0x38] sm:$0xff] %vm721_vm1, %v718_v62 }
 0x2af   : > { %728 = vst.msk [vmem:[%s1640_s15 + $0x30] sm:$0xff] %vm721_vm1, %v713_v0 }
 0x2b0   : > { %s1735_s24 = smov (!%p739_p8, %s738_s24), 8 }
 0x2b1   : > { %s993_s22 = sshll.u32 %s1735_s24, 7 }
 0x2b2   : > { %p996_p9 = scmp.eq.s32.totalorder %s993_s22, 0 }
 0x2b3   : > { %s1671_s23 = sshrl.u32 (!%p996_p9), %s1735_s24, 3 }
 0x2b4   : > { %747 = sbr.rel (%p996_p9) target bundleno = 737 (0x2e1), region = 56  ;;  %p997_p10 = scmp.le.s32.totalorder (!%p996_p9), %s1671_s23, 0 }
 0x2bb   : > { %929 = sbr.rel (%p997_p10) target bundleno = 716 (0x2cc), region = 132  ;;  %s1728_s27 = smov (!%p997_p10), %s1665_s21 }
 0x2bc   : > { %s1729_s9 = smov (!%p997_p10), %s1640_s15  ;;  %s1680_s16 = smov (!%p997_p10), 0  }
 0x2bd   : > { %s1682_s26 = smov (!%p997_p10), 0  }
 0x2c2 LB: >> { %v823_v1 = vld [vmem:[%s1401_s9] sm:$0xff]  ;;  %v825_v2 = vld [vmem:[%s1401_s9 + $0x8] sm:$0xff]  ;;  %v827_v3 = vld [vmem:[%s1401_s9 + $0x10] sm:$0xff]  ;;  %s839_s19 = sadd.s32 1, %s1405_s16  ;;  %s817_s26 = sadd.s32 1, %s1409_s26   ;;  %s1409_s26 = sphi %s1682_s26, %s817_s26   ;;  %s1405_s16 = sphi %s1680_s16, %s1730_s16   ;;  %s1401_s9 = sphi %s1729_s9, %s844_s9   ;;  %s1397_s27 = sphi %s1728_s27, %s845_s27  }
 0x2c3   : >> { %824 = vst [vmem:[%s1397_s27] sm:$0xff] %v823_v1  ;;  %826 = vst [vmem:[%s1397_s27 + $0x8] sm:$0xff] %v825_v2  ;;  %v829_v4 = vld [vmem:[%s1401_s9 + $0x18] sm:$0xff]  ;;  %v831_v5 = vld [vmem:[%s1401_s9 + $0x20] sm:$0xff]  ;;  %p840_p11 = scmp.ge.s32.totalorder %s839_s19, %s1671_s23  ;;  %p816_p12 = scmp.ge.s32.totalorder %s817_s26, %s1671_s23 }
 0x2c4   : >> { %828 = vst [vmem:[%s1397_s27 + $0x10] sm:$0xff] %v827_v3  ;;  %v833_v6 = vld [vmem:[%s1401_s9 + $0x28] sm:$0xff]  ;;  %830 = vst [vmem:[%s1397_s27 + $0x18] sm:$0xff] %v829_v4  ;;  %v835_v7 = vld [vmem:[%s1401_s9 + $0x30] sm:$0xff] }
 0x2c5   : >> { %832 = vst [vmem:[%s1397_s27 + $0x20] sm:$0xff] %v831_v5  ;;  %834 = vst [vmem:[%s1397_s27 + $0x28] sm:$0xff] %v833_v6  ;;  %v837_v8 = vld [vmem:[%s1401_s9 + $0x38] sm:$0xff]  ;;  %s1737_s19 = smov (%p840_p11, %s839_s19), 0  ;;  %819 = sbr.rel (!%p816_p12) target bundleno = 706 (0x2c2), region = 138 }
 0x2c6   : >> { %836 = vst [vmem:[%s1397_s27 + $0x30] sm:$0xff] %v835_v7  ;;  %838 = vst [vmem:[%s1397_s27 + $0x38] sm:$0xff] %v837_v8  ;;  %s998_s29 = sshll.u32 %s1737_s19, 6  ;;  %s1730_s16 = smov %s1737_s19 }
 0x2c7   : >> { %s844_s9 = scalar_lea.vmem %s1640_s15, %s998_s29 [#allocation2]   ;;  %s845_s27 = scalar_lea.vmem %s1665_s21, %s998_s29  }
 0x2cc PF: > { %s1701_s30 = sand.u32 7, %s1735_s24   ;;  %s1009_s10 = sshll.u32 %s1671_s23, 6 }
 0x2cd   : > { %s850_s11 = scalar_lea.vmem %s1640_s15, %s1009_s10 [#allocation2]   ;;  %s852_s12 = scalar_lea.vmem %s1665_s21, %s1009_s10  }
 0x2ce   : > { %p1003_p13 = scmp.le.s32.totalorder %s1701_s30, 0 }
 0x2cf   : > { %s1411_s13 = smov (!%p1003_p13), %s852_s12   ;;  %s1415_s14 = smov (!%p1003_p13), %s850_s11  }
 0x2d0   : > { %943 = sbr.rel (%p1003_p13) target bundleno = 737 (0x2e1), region = 143  ;;  %s1419_s17 = smov (!%p1003_p13), 0  }
 0x2d1   : > { %s1423_s18 = smov (!%p1003_p13), 0  }
 0x2d7 LB: >> { %v862_v9 = vld [vmem:[%s1417_s14] sm:$0xff]  ;;  %s864_s24 = sadd.s32 1, %s1421_s17  ;;  %s856_s18 = sadd.s32 1, %s1425_s18   ;;  %s1425_s18 = sphi %s1423_s18, %s856_s18   ;;  %s1421_s17 = sphi %s1419_s17, %s1420_s17   ;;  %s1417_s14 = sphi %s1415_s14, %s869_s14   ;;  %s1413_s13 = sphi %s1411_s13, %s870_s13  }
 0x2d8   : >> { %863 = vst [vmem:[%s1413_s13] sm:$0xff] %v862_v9  ;;  %p865_p0 = scmp.ge.s32.totalorder %s864_s24, %s1701_s30  ;;  %p855_p1 = scmp.ge.s32.totalorder %s856_s18, %s1701_s30 }
 0x2da   : >> { %s1739_s24 = smov (%p865_p0, %s864_s24), 0  ;;  %858 = sbr.rel (!%p855_p1) target bundleno = 727 (0x2d7), region = 149 }
 0x2db   : >> { %s1004_s15 = sshll.u32 %s1739_s24, 3  ;;  %s1420_s17 = smov %s1739_s24  }
 0x2dc   : >> { %s869_s14 = scalar_lea.vmem %s850_s11, %s1004_s15 [#allocation2]   ;;  %s870_s13 = scalar_lea.vmem %s852_s12, %s1004_s15  }
 0x2e1 PF: > { %p14_p2 = scmp.ge.s32.totalorder %s1482_s28, 4   ;;  %s1731_s24 = smov %s1389_s25 }
 0x2e2   : > { %s1732_s25 = smov %s1490_s8  ;;  %s1733_s26 = smov %s1482_s28 }
 0x2e3   :  { %16 = sbr.rel (!%p14_p2) target bundleno = 2 (0x2), region = 160 }

</bundles_post_ra>
